<compile_context>
chip_gen: v6e
topology: v6e:2x2x1
jax: 0.10.0
libtpu: 0.0.40
codegen_flags: <defaults>
</compile_context>

<pallas_src>
import jax
import jax.numpy as jnp
from jax.experimental import pallas as pl
from jax.experimental.pallas import tpu as pltpu

MXU_DTYPE = jnp.bfloat16      # MXU operand dtype; accumulation stays f32
LANES = 128


def _round_up(x, m):
    return m * (-(-x // m))


def gnn_hetero_kernel(a_ref, x_ref, wl1_ref, wr1_ref, b1_ref,
                      wl2_ref, wr2_ref, b2_ref, out_ref):
    """One graph per grid step: SAGEConv(F->H) + ReLU, SAGEConv(H->128-padded)."""
    A = a_ref[...]            # [N, N]  bf16 row-normalized mean-aggregation matrix
    X = x_ref[...]            # [N, F]  bf16 node features

    # ---- layer 1: mean aggregation + two MXU dots summed in f32 (no lane concat) ----
    agg1 = jnp.dot(A, X, preferred_element_type=jnp.float32)                 # [N, F] f32
    h1 = (jnp.dot(agg1.astype(MXU_DTYPE), wl1_ref[...],
                  preferred_element_type=jnp.float32)
          + jnp.dot(X, wr1_ref[...], preferred_element_type=jnp.float32)
          + b1_ref[...])
    h1 = jnp.maximum(h1, 0.0)                                                # f32 ReLU (v5e-safe)

    # ---- layer 2: same structure, lane-dense 128-wide padded output ----
    h1c = h1.astype(MXU_DTYPE)
    agg2 = jnp.dot(A, h1c, preferred_element_type=jnp.float32)               # [N, H] f32
    out = (jnp.dot(agg2.astype(MXU_DTYPE), wl2_ref[...],
                   preferred_element_type=jnp.float32)
           + jnp.dot(h1c, wr2_ref[...], preferred_element_type=jnp.float32)
           + b2_ref[...])
    out_ref[...] = out.astype(out_ref.dtype)                                 # bf16 unmasked vst


def prepare_params(wl1, wr1, b1, wl2, wr2, b2):
    """One-time weight prep (hoisted out of the forward path / done at model init).

    Weights are stored pre-transposed as [in, out]. Layer-2 weights/bias are
    zero-padded to a 128-lane-dense output width; MXU operands cast to bf16.
    """
    out_dim = wl2.shape[1]
    o_pad = _round_up(out_dim, LANES)
    pad = ((0, 0), (0, o_pad - out_dim))
    return dict(
        wl1=wl1.astype(MXU_DTYPE),                              # [F, H] bf16
        wr1=wr1.astype(MXU_DTYPE),                              # [F, H] bf16
        b1=b1.reshape(1, -1).astype(jnp.float32),               # [1, H] f32
        wl2=jnp.pad(wl2, pad).astype(MXU_DTYPE),                # [H, 128] bf16
        wr2=jnp.pad(wr2, pad).astype(MXU_DTYPE),                # [H, 128] bf16
        b2=jnp.pad(b2.reshape(1, -1), pad).astype(jnp.float32), # [1, 128] f32
        out_dim=out_dim,
    )


def gnn_hetero_forward(A, x, params):
    """Batched 2-layer SAGEConv forward.

    A: [B, N, N] dense row-normalized aggregation matrices (bf16 or castable).
    x: [B, N, F] node features.
    params: output of prepare_params().
    Returns [B, N, out_dim] float32.
    """
    B, N, _ = A.shape
    f_in = x.shape[-1]
    hidden = params["wl1"].shape[1]
    o_pad = params["wl2"].shape[1]
    out_dim = params["out_dim"]

    def const(shape):
        return pl.BlockSpec(shape, lambda b: (0, 0))

    grid_spec = pltpu.PrefetchScalarGridSpec(
        num_scalar_prefetch=0,
        grid=(B,),
        in_specs=[
            pl.BlockSpec((None, N, N), lambda b: (b, 0, 0)),      # A   (per graph)
            pl.BlockSpec((None, N, f_in), lambda b: (b, 0, 0)),   # x   (per graph)
            const((f_in, hidden)),                                # Wl1 (shared)
            const((f_in, hidden)),                                # Wr1
            const((1, hidden)),                                   # b1
            const((hidden, o_pad)),                               # Wl2 (padded)
            const((hidden, o_pad)),                               # Wr2 (padded)
            const((1, o_pad)),                                    # b2  (padded)
        ],
        out_specs=pl.BlockSpec((None, N, o_pad), lambda b: (b, 0, 0)),
    )

    # Rough per-step VMEM working set (double-buffered per-graph operands + output +
    # shared weights). Only raise the scoped limit when it outgrows the smallest
    # default (16 MiB on v5e); small graphs keep the compiler default.
    per_graph = 2 * 2 * (N * N + N * f_in) + 2 * 2 * N * o_pad
    weights = 2 * (2 * f_in * hidden + 2 * hidden * o_pad) + 4 * (hidden + o_pad)
    vmem_est = 2 * (per_graph + weights) + (1 << 20)   # 2x slack + 1 MiB headroom
    vmem_limit = None if vmem_est < (16 << 20) else min(vmem_est, 100 << 20)

    out_pad = pl.pallas_call(
        gnn_hetero_kernel,
        grid_spec=grid_spec,
        out_shape=jax.ShapeDtypeStruct((B, N, o_pad), MXU_DTYPE),
        compiler_params=pltpu.CompilerParams(
            dimension_semantics=("parallel",),     # shard graphs across TCs on v7x
            vmem_limit_bytes=vmem_limit,
        ),
    )(A.astype(MXU_DTYPE), x.astype(MXU_DTYPE),
      params["wl1"], params["wr1"], params["b1"],
      params["wl2"], params["wr2"], params["b2"])

    # Lane-dense bf16 slab from the kernel; tiny slice + f32 upcast outside.
    return out_pad[..., :out_dim].astype(jnp.float32)


def build_aggregation_matrix(edge_index, num_nodes, dtype=MXU_DTYPE):
    """Dense scatter-mean operator: A[i, j] = (#edges j->i) / in_deg(i).

    Built in f32 for exact degree normalization, emitted directly in `dtype`
    (default bf16) so no separate f32 materialization + cast sits on the
    forward path.
    """
    src, dst = edge_index[0], edge_index[1]
    A = jnp.zeros((num_nodes, num_nodes), jnp.float32)
    A = A.at[dst, src].add(1.0)
    deg = A.sum(axis=-1, keepdims=True)
    return (A / jnp.maximum(deg, 1.0)).astype(dtype)


if __name__ == "__main__":
    key = jax.random.PRNGKey(0)
    B, N, F_in, H, O, E = 2, 16, 8, 32, 2, 48

    kx, ke, kp = jax.random.split(key, 3)
    x = jax.random.normal(kx, (B, N, F_in), jnp.float32)

    # Deterministic synthetic graphs: random edges + a ring so every node has neighbors.
    ek = jax.random.split(ke, 2 * B)
    A_f32_list, A_kernel_list = [], []
    for b in range(B):
        rand_src = jax.random.randint(ek[2 * b], (E,), 0, N)
        rand_dst = jax.random.randint(ek[2 * b + 1], (E,), 0, N)
        ring_src = jnp.arange(N, dtype=jnp.int32)
        ring_dst = (ring_src + 1) % N
        edge_index = jnp.stack([jnp.concatenate([rand_src, ring_src]),
                                jnp.concatenate([rand_dst, ring_dst])])   # [2, E + N]
        A_f32_list.append(build_aggregation_matrix(edge_index, N, dtype=jnp.float32))
        A_kernel_list.append(build_aggregation_matrix(edge_index, N))     # bf16 for kernel
    A_f32 = jnp.stack(A_f32_list)
    A_kernel = jnp.stack(A_kernel_list)

    # Deterministic parameter init (PyTorch Linear is [out, in]; we store [in, out]).
    pk = jax.random.split(kp, 6)
    s1, s2 = 1.0 / jnp.sqrt(F_in), 1.0 / jnp.sqrt(H)
    wl1 = jax.random.uniform(pk[0], (F_in, H), jnp.float32, -s1, s1)
    wr1 = jax.random.uniform(pk[1], (F_in, H), jnp.float32, -s1, s1)
    b1 = jax.random.uniform(pk[2], (1, H), jnp.float32, -s1, s1)
    wl2 = jax.random.uniform(pk[3], (H, O), jnp.float32, -s2, s2)
    wr2 = jax.random.uniform(pk[4], (H, O), jnp.float32, -s2, s2)
    b2 = jax.random.uniform(pk[5], (1, O), jnp.float32, -s2, s2)

    params = prepare_params(wl1, wr1, b1, wl2, wr2, b2)   # hoisted: once at "model init"

    out = gnn_hetero_forward(A_kernel, x, params)
    out = jax.block_until_ready(out)

    # Pure-JAX f32 reference (same math). Kernel uses bf16 A / MXU operands / output
    # with f32 accumulation, so compare with a loosened tolerance.
    h1_ref = jnp.maximum(jnp.einsum("bij,bjf->bif", A_f32, x) @ wl1 + x @ wr1 + b1, 0.0)
    out_ref = jnp.einsum("bij,bjh->bih", A_f32, h1_ref) @ wl2 + h1_ref @ wr2 + b2

    assert out.shape == (B, N, O)
    max_err = float(jnp.max(jnp.abs(out - out_ref)))
    assert jnp.allclose(out, out_ref, atol=1e-1, rtol=5e-2), f"max abs err {max_err}"

    print("KERNEL_OK")
</pallas_src>

<mosaic_0001>
module attributes {stable_mosaic.version = 11 : i64} {
  func.func @gnn_hetero_kernel(%arg0: i32, %arg1: memref<1x16x16xbf16, #tpu.memory_space<vmem>>, %arg2: memref<1x16x8xbf16, #tpu.memory_space<vmem>>, %arg3: memref<8x32xbf16, #tpu.memory_space<vmem>>, %arg4: memref<8x32xbf16, #tpu.memory_space<vmem>>, %arg5: memref<1x32xf32, #tpu.memory_space<vmem>>, %arg6: memref<32x128xbf16, #tpu.memory_space<vmem>>, %arg7: memref<32x128xbf16, #tpu.memory_space<vmem>>, %arg8: memref<1x128xf32, #tpu.memory_space<vmem>>, %arg9: memref<1x16x128xbf16, #tpu.memory_space<vmem>>) attributes {dimension_semantics = [#tpu.dimension_semantics<parallel>], iteration_bounds = array<i64: 2>, scalar_prefetch = 0 : i64, scratch_operands = 0 : i64, tpu.core_type = #tpu.core_type<tc>, window_params = [{transform_indices = @transform_0, window_bounds = array<i64: 1, 16, 16>}, {transform_indices = @transform_1, window_bounds = array<i64: 1, 16, 8>}, {pipeline_mode = #tpu.pipeline_mode<synchronous>, transform_indices = @transform_2, window_bounds = array<i64: 8, 32>}, {pipeline_mode = #tpu.pipeline_mode<synchronous>, transform_indices = @transform_3, window_bounds = array<i64: 8, 32>}, {pipeline_mode = #tpu.pipeline_mode<synchronous>, transform_indices = @transform_4, window_bounds = array<i64: 1, 32>}, {pipeline_mode = #tpu.pipeline_mode<synchronous>, transform_indices = @transform_5, window_bounds = array<i64: 32, 128>}, {pipeline_mode = #tpu.pipeline_mode<synchronous>, transform_indices = @transform_6, window_bounds = array<i64: 32, 128>}, {pipeline_mode = #tpu.pipeline_mode<synchronous>, transform_indices = @transform_7, window_bounds = array<i64: 1, 128>}, {transform_indices = @transform_8, window_bounds = array<i64: 1, 16, 128>}]} {
    %c0 = arith.constant 0 : index
    %c0_0 = arith.constant 0 : index
    %c0_1 = arith.constant 0 : index
    %0 = vector.load %arg1[%c0, %c0_0, %c0_1] : memref<1x16x16xbf16, #tpu.memory_space<vmem>>, vector<1x16x16xbf16>
    %1 = vector.shape_cast %0 : vector<1x16x16xbf16> to vector<16x16xbf16>
    %c0_2 = arith.constant 0 : index
    %c0_3 = arith.constant 0 : index
    %c0_4 = arith.constant 0 : index
    %2 = vector.load %arg2[%c0_2, %c0_3, %c0_4] : memref<1x16x8xbf16, #tpu.memory_space<vmem>>, vector<1x16x8xbf16>
    %3 = vector.shape_cast %2 : vector<1x16x8xbf16> to vector<16x8xbf16>
    %cst = arith.constant dense<0.000000e+00> : vector<16x8xf32>
    %4 = tpu.matmul %1, %3, %cst {dimension_numbers = #tpu.dot_dimension_numbers<[1], [0], [0], [1], [0, 0, 1, 1], [], []>} : vector<16x16xbf16>, vector<16x8xbf16>, vector<16x8xf32> -> vector<16x8xf32>
    %5 = arith.truncf %4 : vector<16x8xf32> to vector<16x8xbf16>
    %c0_5 = arith.constant 0 : index
    %c0_6 = arith.constant 0 : index
    %6 = vector.load %arg3[%c0_5, %c0_6] : memref<8x32xbf16, #tpu.memory_space<vmem>>, vector<8x32xbf16>
    %cst_7 = arith.constant dense<0.000000e+00> : vector<16x32xf32>
    %7 = tpu.matmul %5, %6, %cst_7 {dimension_numbers = #tpu.dot_dimension_numbers<[1], [0], [0], [1], [0, 0, 1, 1], [], []>} : vector<16x8xbf16>, vector<8x32xbf16>, vector<16x32xf32> -> vector<16x32xf32>
    %c0_8 = arith.constant 0 : index
    %c0_9 = arith.constant 0 : index
    %8 = vector.load %arg4[%c0_8, %c0_9] : memref<8x32xbf16, #tpu.memory_space<vmem>>, vector<8x32xbf16>
    %cst_10 = arith.constant dense<0.000000e+00> : vector<16x32xf32>
    %9 = tpu.matmul %3, %8, %cst_10 {dimension_numbers = #tpu.dot_dimension_numbers<[1], [0], [0], [1], [0, 0, 1, 1], [], []>} : vector<16x8xbf16>, vector<8x32xbf16>, vector<16x32xf32> -> vector<16x32xf32>
    %10 = arith.addf %7, %9 : vector<16x32xf32>
    %c0_11 = arith.constant 0 : index
    %c0_12 = arith.constant 0 : index
    %11 = vector.load %arg5[%c0_11, %c0_12] : memref<1x32xf32, #tpu.memory_space<vmem>>, vector<1x32xf32>
    %12 = vector.broadcast %11 : vector<1x32xf32> to vector<16x32xf32>
    %13 = arith.addf %10, %12 : vector<16x32xf32>
    %cst_13 = arith.constant 0.000000e+00 : f32
    %14 = vector.broadcast %cst_13 : f32 to vector<16x32xf32>
    %15 = arith.maximumf %13, %14 : vector<16x32xf32>
    %16 = arith.truncf %15 : vector<16x32xf32> to vector<16x32xbf16>
    %cst_14 = arith.constant dense<0.000000e+00> : vector<16x32xf32>
    %17 = tpu.matmul %1, %16, %cst_14 {dimension_numbers = #tpu.dot_dimension_numbers<[1], [0], [0], [1], [0, 0, 1, 1], [], []>} : vector<16x16xbf16>, vector<16x32xbf16>, vector<16x32xf32> -> vector<16x32xf32>
    %18 = arith.truncf %17 : vector<16x32xf32> to vector<16x32xbf16>
    %c0_15 = arith.constant 0 : index
    %c0_16 = arith.constant 0 : index
    %19 = vector.load %arg6[%c0_15, %c0_16] : memref<32x128xbf16, #tpu.memory_space<vmem>>, vector<32x128xbf16>
    %cst_17 = arith.constant dense<0.000000e+00> : vector<16x128xf32>
    %20 = tpu.matmul %18, %19, %cst_17 {dimension_numbers = #tpu.dot_dimension_numbers<[1], [0], [0], [1], [0, 0, 1, 1], [], []>} : vector<16x32xbf16>, vector<32x128xbf16>, vector<16x128xf32> -> vector<16x128xf32>
    %c0_18 = arith.constant 0 : index
    %c0_19 = arith.constant 0 : index
    %21 = vector.load %arg7[%c0_18, %c0_19] : memref<32x128xbf16, #tpu.memory_space<vmem>>, vector<32x128xbf16>
    %cst_20 = arith.constant dense<0.000000e+00> : vector<16x128xf32>
    %22 = tpu.matmul %16, %21, %cst_20 {dimension_numbers = #tpu.dot_dimension_numbers<[1], [0], [0], [1], [0, 0, 1, 1], [], []>} : vector<16x32xbf16>, vector<32x128xbf16>, vector<16x128xf32> -> vector<16x128xf32>
    %23 = arith.addf %20, %22 : vector<16x128xf32>
    %c0_21 = arith.constant 0 : index
    %c0_22 = arith.constant 0 : index
    %24 = vector.load %arg8[%c0_21, %c0_22] : memref<1x128xf32, #tpu.memory_space<vmem>>, vector<1x128xf32>
    %25 = vector.broadcast %24 : vector<1x128xf32> to vector<16x128xf32>
    %26 = arith.addf %23, %25 : vector<16x128xf32>
    %27 = arith.truncf %26 : vector<16x128xf32> to vector<16x128xbf16>
    %c0_23 = arith.constant 0 : index
    %c0_24 = arith.constant 0 : index
    %c0_25 = arith.constant 0 : index
    %28 = vector.load %arg9[%c0_23, %c0_24, %c0_25] : memref<1x16x128xbf16, #tpu.memory_space<vmem>>, vector<1x16x128xbf16>
    %29 = vector.shape_cast %28 : vector<1x16x128xbf16> to vector<16x128xbf16>
    %30 = vector.shape_cast %27 : vector<16x128xbf16> to vector<1x16x128xbf16>
    tpu.vector_store %arg9[%c0_23, %c0_24, %c0_25], %30 {strides = array<i32>} : memref<1x16x128xbf16, #tpu.memory_space<vmem>>, vector<1x16x128xbf16>,
    return
  }
  func.func @transform_0(%arg0: i32) -> (i32, i32, i32) {
    %c0_i32 = arith.constant 0 : i32
    %c0_i32_0 = arith.constant 0 : i32
    %c0_i32_1 = arith.constant 0 : i32
    return %arg0, %c0_i32, %c0_i32_0 : i32, i32, i32
  }
  func.func @transform_1(%arg0: i32) -> (i32, i32, i32) {
    %c0_i32 = arith.constant 0 : i32
    %c0_i32_0 = arith.constant 0 : i32
    %c0_i32_1 = arith.constant 0 : i32
    return %arg0, %c0_i32, %c0_i32_0 : i32, i32, i32
  }
  func.func @transform_2(%arg0: i32) -> (i32, i32) {
    %c0_i32 = arith.constant 0 : i32
    %c0_i32_0 = arith.constant 0 : i32
    %c0_i32_1 = arith.constant 0 : i32
    return %c0_i32, %c0_i32_0 : i32, i32
  }
  func.func @transform_3(%arg0: i32) -> (i32, i32) {
    %c0_i32 = arith.constant 0 : i32
    %c0_i32_0 = arith.constant 0 : i32
    %c0_i32_1 = arith.constant 0 : i32
    return %c0_i32, %c0_i32_0 : i32, i32
  }
  func.func @transform_4(%arg0: i32) -> (i32, i32) {
    %c0_i32 = arith.constant 0 : i32
    %c0_i32_0 = arith.constant 0 : i32
    %c0_i32_1 = arith.constant 0 : i32
    return %c0_i32, %c0_i32_0 : i32, i32
  }
  func.func @transform_5(%arg0: i32) -> (i32, i32) {
    %c0_i32 = arith.constant 0 : i32
    %c0_i32_0 = arith.constant 0 : i32
    %c0_i32_1 = arith.constant 0 : i32
    return %c0_i32, %c0_i32_0 : i32, i32
  }
  func.func @transform_6(%arg0: i32) -> (i32, i32) {
    %c0_i32 = arith.constant 0 : i32
    %c0_i32_0 = arith.constant 0 : i32
    %c0_i32_1 = arith.constant 0 : i32
    return %c0_i32, %c0_i32_0 : i32, i32
  }
  func.func @transform_7(%arg0: i32) -> (i32, i32) {
    %c0_i32 = arith.constant 0 : i32
    %c0_i32_0 = arith.constant 0 : i32
    %c0_i32_1 = arith.constant 0 : i32
    return %c0_i32, %c0_i32_0 : i32, i32
  }
  func.func @transform_8(%arg0: i32) -> (i32, i32, i32) {
    %c0_i32 = arith.constant 0 : i32
    %c0_i32_0 = arith.constant 0 : i32
    %c0_i32_1 = arith.constant 0 : i32
    return %arg0, %c0_i32, %c0_i32_0 : i32, i32, i32
  }
}

</mosaic_0001>

<bundles_post_ra>
// kernel: tpu_custom_call.1
= control target key start
LH: loop header
LB: loop body
LE: loop exit
PB: predicated region body
PF: predicated region fallthrough
CT: control target
= control target key end

     0   :  { %13 = vsyncpa [#allocation3], 0  ;;  %s1419_s0 = inlined_call_operand.vmem [shape: bf16[2,16,16], index: 0, kind: input, shape index: {}]   ;;  %s1420_s1 = inlined_call_operand.vmem [shape: bf16[2,16,8], index: 1, kind: input, shape index: {}]   ;;  %s1421_s2 = inlined_call_operand.hbm [shape: bf16[8,32], index: 2, kind: input, shape index: {}]   ;;  %s1422_s3 = inlined_call_operand.hbm [shape: bf16[8,32], index: 3, kind: input, shape index: {}]   ;;  %s1423_s4 = inlined_call_operand.vmem [shape: f32[1,32], index: 4, kind: input, shape index: {}]   ;;  %s1424_s5 = inlined_call_operand.vmem [shape: bf16[32,128], index: 5, kind: input, shape index: {}]   ;;  %s1425_s6 = inlined_call_operand.hbm [shape: bf16[32,128], index: 6, kind: input, shape index: {}]   ;;  %s1426_s7 = inlined_call_operand.vmem [shape: f32[1,128], index: 7, kind: input, shape index: {}]   ;;  %s1427_s8 = inlined_call_operand.hbm [shape: bf16[2,16,128], index: 8, kind: output, shape index: {}]  }
   0x1   :  { %14 = vsyncpa [#allocation6], 0 }
   0x2   :  { %15 = vsyncpa [#allocation4], 0 }
   0x3   :  { %17 = vsyncpa [#allocation4 + $0x1], 0  ;;  %s1222_s27 = smov 0   ;;  %s1224_s28 = smov 0  }
   0x4   :  { %s1226_s29 = smov 0   ;;  %s1228_s30 = smov 0  }
   0x5 LB: > { %s1243_s9 = sadd.s32 4294967295, %s1165_s30   ;;  %s837_s10 = sadd.s32 4294967294, %s1165_s30   ;;  %s1165_s30 = sphi %s1228_s30, %s1445_s30   ;;  %s1161_s29 = sphi %s1226_s29, %s1444_s29   ;;  %s1157_s28 = sphi %s1224_s28, %s1443_s28   ;;  %s1153_s27 = sphi %s1222_s27, %s1442_s27  }
   0x6   : > { %s1247_s11 = sadd.s32 1, %s1165_s30   ;;  %s208_s12 = sadd.s32 1, %s1161_s29 }
   0x7   : > { %s205_s13 = ssub.s32 %s1165_s30, %s1247_s11  ;;  %p218_p0 = scmp.ne.s32.totalorder %s1161_s29, %s1157_s28 }
   0x8   : > { %p206_p1 = scmp.eq.s32.totalorder %s205_s13, 0  ;;  %p219_p2 = scmp.eq.s32.totalorder %s1243_s9, 1 }
   0x9   : > { %p224_p3 = scmp.ne.s32.totalorder %s1157_s28, %s1153_s27  ;;  %p225_p4 = scmp.eq.s32.totalorder %s837_s10, 1 }
   0xa   : > { %s1258_s14 = scalar_select %p206_p1, %s1161_s29, %s208_s12  }
   0xb   : > { %p1260_p5 = por %p219_p2, %p218_p0  ;;  %p1264_p6 = por %p225_p4, %p224_p3 }
   0xc   : > { %p838_p7 = scmp.ge.s32.totalorder %s1165_s30, 1  ;;  %p232_p8 = scmp.lt.s32.totalorder %s1165_s30, 3 }
   0xd   : > { %s1431_s15 = scalar_select %p1260_p5, 1, 0 }
   0xe   : > { %s1432_s16 = scalar_select %p1264_p6, 1, 0 }
   0xf   : > { %p1428_p9 = scmp.eq.s32.totalorder %s1243_s9, 0  ;;  %p1271_p10 = pnand %p838_p7, %p232_p8 }
  0x10   : > { %s1167_s18 = smov [#allocation5]   ;;  %s1168_s20 = smov [#allocation2]  }
  0x11   : > { %s1433_s17 = scalar_select %p1271_p10, 1, 0 }
  0x12   : > { %s256_s19 = sshll.u32 %s1167_s18, 4  ;;  %p951_p11 = pneg %p1271_p10  ;;  %s257_s19 = int_to_ptr.vmem [resolvable:$true] %s256_s19 }
  0x13   : > { %s245_s21 = sshll.u32 %s1168_s20, 4  ;;  %s1169_s23 = smov [#allocation7]   ;;  %s246_s21 = int_to_ptr.vmem [resolvable:$true] %s245_s21 }
  0x14   : > { %p1279_p12 = pnand %p1428_p9, %p951_p11  ;;  %s272_s24 = sshll.u32 %s1169_s23, 4  ;;  %s1283_s24 = int_to_ptr.vmem [resolvable:$true] %s272_s24 }
  0x15   : > { %s1030_s25 = scalar_lea.vmem %s257_s19, 64  ;;  %p1038_p3 = scmp.lt.s32.totalorder %s257_s19, %s257_s19 }
  0x16   : > { %p1021_p13 = pneg %p1279_p12  ;;  %p1031_p0 = scmp.ne.s32.totalorder %s257_s19, %s1030_s25 }
  0x17   : > { %p1039_p4 = scmp.lt.s32.totalorder %s1030_s25, %s1030_s25 }
  0x18   : > { %p1033_p1 = pnand %p1031_p0, %p1021_p13 }
  0x19   : > { %p1040_p7 = por %p1039_p4, %p1038_p3 }
  0x1a   : > { %p1034_p2 = pneg %p1033_p1 }
  0x1c   : > { %p1041_p8 = pnand %p1040_p7, %p1034_p2 }
  0x1e   : > { %1044 = shalt.err (!%p1041_p8)
}
  0x1f   : > { %957 = dma.hbm_to_vmem [thread:$0]  (!%p1279_p12), %s1422_s3, 64, %s257_s19, [#allocation6]  }
  0x20   : > { %s1056_s12 = scalar_lea.vmem %s246_s21, 64  ;;  %p1064_p0 = scmp.lt.s32.totalorder %s246_s21, %s246_s21 }
  0x21   : > { %p1057_p11 = scmp.ne.s32.totalorder %s246_s21, %s1056_s12  ;;  %p1065_p1 = scmp.lt.s32.totalorder %s1056_s12, %s1056_s12 }
  0x23   : > { %p1059_p9 = pnand %p1057_p11, %p1021_p13  ;;  %p1066_p5 = por %p1065_p1, %p1064_p0 }
  0x25   : > { %p1060_p6 = pneg %p1059_p9 }
  0x27   : > { %p1067_p10 = pnand %p1066_p5, %p1060_p6 }
  0x29   : > { %1070 = shalt.err (!%p1067_p10)
}
  0x2a   : > { %954 = dma.hbm_to_vmem [thread:$0]  (!%p1279_p12), %s1421_s2, 64, %s246_s21, [#allocation3]  }
  0x2b   : > { %s1082_s19 = scalar_lea.vmem %s1283_s24, 256  ;;  %p1090_p4 = scmp.lt.s32.totalorder %s1283_s24, %s1283_s24 }
  0x2c   : > { %p1083_p2 = scmp.ne.s32.totalorder %s1283_s24, %s1082_s19  ;;  %p1091_p5 = scmp.lt.s32.totalorder %s1082_s19, %s1082_s19 }
  0x2e   : > { %p1085_p9 = pnand %p1083_p2, %p1021_p13  ;;  %p1092_p6 = por %p1091_p5, %p1090_p4 }
  0x30   : > { %p1086_p3 = pneg %p1085_p9 }
  0x32   : > { %p1093_p10 = pnand %p1092_p6, %p1086_p3 }
  0x34   : > { %1096 = shalt.err (!%p1093_p10)
}
  0x35   : > { %s1170_s20 = smov 64   ;;  %s1171_s23 = smov 4  }
  0x36   : > { %960 = dma.hbm_to_vmem [thread:$0]  (!%p1279_p12), %s1425_s6, 256, %s1283_s24, [#allocation6], %s1170_s20, %s1170_s20, %s1171_s23  }
  0x37   : > { %p1435_p7 = scmp.ne.s32.totalorder %s1433_s17, 0 }
  0x38   : > { %p1436_p13 = scmp.eq.s32.totalorder (!%p1435_p7), %s1243_s9, 0 }
  0x39   : > { %307 = sbr.rel (%p1435_p7) target bundleno = 900 (0x384), region = 52 }
  0x3e   : > { %1140 = dma.done.wait (%p1436_p13), [#allocation3], 64   ;;  %p1437_p8 = pmov %p1436_p13 }
  0x40   : > { %1142 = vsyncadd (%p1437_p8), [#allocation3], 4294967232  ;;  %p1438_p11 = pmov %p1437_p8 }
  0x41   : > { %p1439_p0 = pmov %p1437_p8 }
  0x42   : > { %1144 = dma.done.wait (%p1438_p11), [#allocation6], 320  }
  0x43   : > { %1146 = vsyncadd (%p1439_p0), [#allocation6], 4294966976  ;;  %p354_p1 = scmp.lt.s32.totalorder %s1243_s9, 1  ;;  %v1172_v0 = vmov 0.0   ;;  %vm1173_vm0 = vmmov 0   ;;  %vm432_vm1 = vcmask 1043456  }
  0x44   : > { %897 = vmatprep.subr.bf16.mxu0 %v1172_v0  ;;  %899 = vmatprep.mubr.msk.bf16.mxu0 %vm1173_vm0, %v1172_v0  ;;  %vm380_vm2 = vcmask 130048   ;;  %v426_v3 = vld [vmem:[#allocation2] sm:$0xf]  ;;  %v427_v4 = vld [vmem:[#allocation5] sm:$0xf]  ;;  %vm428_vm3 = vcmask 64512  }
  0x45   : > { %s355_s17 = scalar_select %p354_p1, %s1243_s9, 1  ;;  %903 = vmatprep.subr.bf16.mxu1 %v1172_v0  ;;  %905 = vmatprep.mubr.msk.bf16.mxu1 %vm1173_vm0, %v1172_v0  ;;  %v434_v5 = vsel %vm432_vm1, %v427_v4, 0  ;;  %v481_v6 = vsel %vm432_vm1, %v426_v3, 0  ;;  %v1015_v16 = vld [vmem:[#allocation7 + $0x8] sm:$0xff]   ;;  %v1016_v17 = vld [vmem:[#allocation7] sm:$0xff]   ;;  %vm598_vm4 = vcmask 261120  }
  0x46   : > { %904 = vmatpush3.bf16.msra.mxu1 %v434_v5  ;;  %v857_v20 = vld [vmem:[%s1423_s4] ss:$0 sm:$0xff]  ;;  %v1017_v30 = vld [vmem:[%s1424_s5 + $0x8] sm:$0xff]   ;;  %s877_s12 = sshll.u32 %s1243_s9, 7  ;;  %p1440_p2 = scmp.ne.s32.totalorder %s1431_s15, 0 }
  0x47   : > { %s873_s21 = sshll.u32 %s355_s17, 3  ;;  %915 = vmatprep.subr.bf16.mxu1 %v1172_v0  ;;  %v1018_v31 = vld [vmem:[%s1424_s5] sm:$0xff]   ;;  %s1375_s23 = scalar_lea.hbm %s1427_s8, %s877_s12 }
  0x48   : > { %s358_s10 = scalar_lea.vmem %s1419_s0, %s873_s21  ;;  %s363_s18 = scalar_lea.vmem %s1420_s1, %s873_s21  ;;  %v865_v44 = vld [vmem:[%s1426_s7] ss:$0 sm:$0xff] }
  0x49   : > { %v1013_v1 = vld [vmem:[%s363_s18] sm:$0xff]   ;;  %s351_s21 = sand.u32 1, %s1157_s28   ;;  %s1174_s26 = smov [#allocation8]  }
  0x4a   : > { %v1014_v2 = vld [vmem:[%s358_s10] sm:$0xff]   ;;  %898 = vmatpush3.bf16.msra.mxu0 %v1013_v1  ;;  %906 = vmatmul.mubr.msk.bf16.vlgmr.msra.gmra.mxu1 %vm428_vm3, %v1013_v1  ;;  %s847_s22 = sshll.u32 %s351_s21, 3  ;;  %s1379_s25 = scalar_lea.sflag [#allocation4], %s351_s21 }
  0x4b   : > { %909 = vmatprep.subr.bf16.mxu0 %v1172_v0  ;;  %917 = vmatprep.mubr.msk.bf16.mxu1 %vm1173_vm0, %v1172_v0  ;;  %s353_s13 = scalar_lea.vmem [#allocation8], %s847_s22  ;;  %s1101_s17 = sshll.u32 %s1174_s26, 4  ;;  %s1102_s17 = int_to_ptr.vmem [resolvable:$false] %s1101_s17 }
  0x4c   : > { %s732_s18 = sshll.u32 %s353_s13, 4  ;;  %s1103_s22 = scalar_lea.vmem %s1102_s17, 256  ;;  %s1377_s18 = int_to_ptr.vmem [resolvable:$true] %s732_s18 }
  0x4d   : > { %900 = vmatmul.mubr.msk.bf16.vlgmr.msra.gmra.mxu0 %vm380_vm2, %v1014_v2  ;;  %s1097_s9 = scalar_lea.vmem %s1377_s18, 128  ;;  %p1104_p4 = scmp.lt.s32.totalorder %s1377_s18, %s1102_s17 }
  0x4e   : > { %910 = vmatpush3.bf16.msra.mxu0 %v481_v6  ;;  %911 = vmatprep.mubr.msk.bf16.mxu0 %vm1173_vm0, %v1172_v0  ;;  %p1098_p12 = scmp.ne.s32.totalorder %s1377_s18, %s1097_s9  ;;  %p1105_p5 = scmp.lt.s32.totalorder %s1103_s22, %s1097_s9 }
  0x4f   : > { %921 = vmatprep.subr.bf16.mxu0 %v1172_v0 }
  0x50   : > { %p1099_p9 = pnand %p1098_p12, %p1440_p2  ;;  %p1106_p6 = por %p1105_p5, %p1104_p4 }
  0x52   : > { %p1100_p3 = pneg %p1099_p9 }
  0x54   : > { %p1107_p10 = pnand %p1106_p6, %p1100_p3 }
 0x10a   : > { %v470_v12 = vpop.f32.mrf.mxu1 }
 0x10c   : > { %v907_v13 = vpop.f32.mrf.mxu1 }
 0x10d   : > { %v418_v7 = vpop.f32.mrf.mxu0 }
 0x10e   : > { %v473_v14 = vpop.f32.mrf.mxu1 }
 0x10f   : > { %v901_v8 = vpop.f32.mrf.mxu0 }
 0x110   : > { %v908_v15 = vpop.f32.mrf.mxu1 }
 0x111   : > { %v421_v9 = vpop.f32.mrf.mxu0 }
 0x112   : > { %v425_v10 = vpack.c.bf16 %v421_v9, %v418_v7 }
 0x113   : > { %v902_v11 = vpop.f32.mrf.mxu0 }
 0x114   : > { %912 = vmatmul.mubr.msk.bf16.vlgmr.msra.gmra.mxu0 %vm428_vm3, %v425_v10 }
 0x115   : > { %925 = vmatprep.mubr.msk.bf16.mxu0 %vm1173_vm0, %v1172_v0  ;;  %922 = vmatpush3.bf16.msra.mxu0 %v1015_v16 }
 0x116   : > { %923 = vmatprep.subr.bf16.mxu0 %v1172_v0 }
 0x119   : > { %924 = vmatpush3.bf16.msra.mxu0 %v1016_v17 }
 0x1d4   : > { %v517_v18 = vpop.f32.mrf.mxu0 }
 0x1d5   : > { %v518_v19 = vadd.f32 %v517_v18, %v470_v12 }
 0x1d6   : > { %v913_v21 = vpop.f32.mrf.mxu0 }
 0x1d7   : > { %v531_v23 = vadd.f32 %v857_v20, %v518_v19 }
 0x1d8   : > { %v520_v22 = vpop.f32.mrf.mxu0 }
 0x1d9   : > { %v521_v24 = vadd.f32 %v520_v22, %v473_v14  ;;  %v533_v27 = vmax.f32 %v531_v23, 0.0 }
 0x1da   : > { %v914_v25 = vpop.f32.mrf.mxu0 }
 0x1db   : > { %v532_v26 = vadd.f32 %v857_v20, %v521_v24 }
 0x1dd   : > { %v534_v28 = vmax.f32 %v532_v26, 0.0 }
 0x1df   : > { %v535_v29 = vpack.c.bf16 %v534_v28, %v533_v27 }
 0x1e1   : > { %916 = vmatpush3.bf16.msra.mxu1 %v535_v29  ;;  %926 = vmatmul.mubr.msk.bf16.vlgmr.msra.gmra.mxu0 %vm598_vm4, %v535_v29 }
 0x1e2   : > { %929 = vmatprep.subr.bf16.mxu1 %v1172_v0 }
 0x1e4   : > { %918 = vmatmul.mubr.msk.bf16.vlgmr.msra.gmra.mxu1 %vm380_vm2, %v1014_v2 }
 0x1e5   : > { %933 = vmatprep.mubr.msk.bf16.mxu1 %vm1173_vm0, %v1172_v0  ;;  %930 = vmatpush3.bf16.msra.mxu1 %v1017_v30 }
 0x1e6   : > { %931 = vmatprep.subr.bf16.mxu1 %v1172_v0 }
 0x1e9   : > { %932 = vmatpush3.bf16.msra.mxu1 %v1018_v31 }
 0x2a1   : > { %v636_v32 = vpop.f32.mrf.mxu0 }
 0x2a3   : > { %v927_v33 = vpop.f32.mrf.mxu0 }
 0x2a4   : > { %v570_v34 = vpop.f32.mrf.mxu1 }
 0x2a5   : > { %v639_v35 = vpop.f32.mrf.mxu0 }
 0x2a6   : > { %v919_v36 = vpop.f32.mrf.mxu1 }
 0x2a7   : > { %v928_v37 = vpop.f32.mrf.mxu0 }
 0x2a8   : > { %v573_v38 = vpop.f32.mrf.mxu1 }
 0x2a9   : > { %v577_v39 = vpack.c.bf16 %v573_v38, %v570_v34 }
 0x2aa   : > { %v920_v40 = vpop.f32.mrf.mxu1 }
 0x2ab   : > { %934 = vmatmul.mubr.msk.bf16.vlgmr.msra.gmra.mxu1 %vm598_vm4, %v577_v39 }
 0x36b   : > { %v692_v41 = vpop.f32.mrf.mxu1 }
 0x36c   : > { %v693_v43 = vadd.f32 %v692_v41, %v636_v32 }
 0x36d   : > { %v935_v42 = vpop.f32.mrf.mxu1 }
 0x36e   : > { %v706_v48 = vadd.f32 %v865_v44, %v693_v43 }
 0x36f   : > { %v695_v45 = vpop.f32.mrf.mxu1 }
 0x370   : > { %v696_v46 = vadd.f32 %v695_v45, %v639_v35 }
 0x371   : > { %v936_v47 = vpop.f32.mrf.mxu1 }
 0x372   : > { %v707_v49 = vadd.f32 %v865_v44, %v696_v46 }
 0x374   : > { %v881_v50 = vpack.c.bf16 %v707_v49, %v706_v48 }
 0x376   : > { %882 = vst [vmem:[%s353_s13] sm:$0xff] %v881_v50  }
 0x377   : > { %1110 = shalt.err (!%p1107_p10)
}
 0x378   : > { %s1111_s21 = scalar_lea.hbm %s1375_s23, 128  ;;  %s1115_s12 = scalar_lea.hbm %s1427_s8, 256 }
 0x379   : > { %p1112_p7 = scmp.ne.s32.totalorder %s1375_s23, %s1111_s21  ;;  %p1116_p11 = scmp.lt.s32.totalorder %s1375_s23, %s1427_s8 }
 0x37a   : > { %p1117_p0 = scmp.lt.s32.totalorder %s1115_s12, %s1111_s21 }
 0x37b   : > { %p1113_p13 = pnand %p1112_p7, %p1440_p2 }
 0x37c   : > { %p1118_p1 = por %p1117_p0, %p1116_p11 }
 0x37d   : > { %p1114_p8 = pneg %p1113_p13 }
 0x37f   : > { %p1119_p12 = pnand %p1118_p1, %p1114_p8 }
 0x381   : > { %1122 = shalt.err (!%p1119_p12)
}
 0x382   : > { %s1175_s20 = smov 64   ;;  %s1176_s9 = smov 4  }
 0x383   : > { %949 = dma.vmem_to_hbm [thread:$0]  (%p1440_p2), %s1377_s18, 128, %s1375_s23, %s1379_s25, %s1175_s20, %s1175_s20, %s1176_s9  }
 0x384 PF: > { %p971_p9 = scmp.ge.s32.totalorder %s1165_s30, 2  ;;  %s747_s26 = sand.u32 1, %s1153_s27  }
 0x385   : > { %p1441_p3 = scmp.ne.s32.totalorder %s1432_s16, 0  ;;  %s748_s17 = scalar_lea.sflag [#allocation4], %s747_s26 }
 0x387   : > { %p962_p4 = pnand %p971_p9, %p1441_p3 }
 0x389   : > { %p963_p5 = pneg %p962_p4 }
 0x38b   : > { %1148 = dma.done.wait (%p963_p5), %s748_s17, 128  }
 0x38c   : > { %1150 = vsyncadd (%p963_p5), %s748_s17, 4294967168  ;;  %p20_p6 = scmp.ge.s32.totalorder %s1247_s11, 4   ;;  %s1442_s27 = smov %s1157_s28 }
 0x38d   : > { %s1443_s28 = smov %s1161_s29  ;;  %s1444_s29 = smov %s1258_s14 }
 0x38e   : > { %s1445_s30 = smov %s1247_s11  ;;  %22 = sbr.rel (!%p20_p6) target bundleno = 5 (0x5), region = 103 }
 0x393   :  { %753 = vsyncpa [#allocation3], 1 }
 0x394   :  { %755 = vsyncpa [#allocation3 + $0x1], 1 }
 0x395   :  { %756 = vsyncpa [#allocation6], 1 }
 0x396   :  { %757 = vsyncpa [#allocation4], 1 }
 0x397   :  { %759 = vsyncpa [#allocation4 + $0x1], 1 }

</bundles_post_ra>
